<compile_context>
chip_gen: v7x
topology: tpu7x:2x2x1
jax: 0.10.0
libtpu: 0.0.40
codegen_flags: <defaults>
</compile_context>

<pallas_src>
import jax
import jax.numpy as jnp
from jax.experimental import pallas as pl
from jax.experimental.pallas import tpu as pltpu


def attention_kernel(dec_ref, lis_ref, wphi_ref, bphi_ref, wpsi_ref, bpsi_ref,
                     score_ref, ctx_ref):
    dec = dec_ref[...]                      # (Bb, D)    compute dtype
    lis = lis_ref[...]                      # (Bb, T, D) compute dtype
    Bb, T, D = lis.shape

    # ---- MLP preprocessing (MXU, f32 accumulate) + ReLU (VPU, f32) ----------
    # decoder: (Bb, D) @ (D, P) -> (Bb, P)
    comp_dec = jnp.maximum(
        jnp.dot(dec, wphi_ref[...], preferred_element_type=jnp.float32)
        + bphi_ref[...], 0.0)                                       # (Bb, P) f32

    # listener (TimeDistributed Linear): flatten (Bb, T) into one big matmul
    lis2 = lis.reshape(Bb * T, D)
    comp_lis = jnp.maximum(
        jnp.dot(lis2, wpsi_ref[...], preferred_element_type=jnp.float32)
        + bpsi_ref[...], 0.0)                                       # (Bb*T, P) f32
    comp_lis = comp_lis.reshape(Bb, T, P_DIM_PLACEHOLDER) if False else \
        comp_lis.reshape(Bb, T, wpsi_ref.shape[1])                  # (Bb, T, P) f32

    # ---- dot-mode energy: energy[b, t] = <comp_dec[b], comp_lis[b, t]> ------
    # Per-batch matvec -> do it on the VPU (multiply + lane reduce); no
    # materialized transpose of comp_lis.
    energy = jnp.sum(comp_lis * comp_dec[:, None, :], axis=-1)      # (Bb, T) f32

    # ---- softmax over T (f32) ----------------------------------------------
    m = jnp.max(energy, axis=-1, keepdims=True)
    e = jnp.exp(energy - m)
    denom = jnp.sum(e, axis=-1, keepdims=True)
    attn = e * pl.reciprocal(denom, approx=True)                    # (Bb, T) f32
    score_ref[...] = attn.astype(score_ref.dtype)

    # ---- context[b, d] = sum_t attn[b, t] * listener_feature[b, t, d] -------
    ctx = jnp.sum(lis.astype(jnp.float32) * attn[:, :, None], axis=1)  # (Bb, D)
    ctx_ref[...] = ctx.astype(ctx_ref.dtype)

    # TODO(synk): for very long T, add a second "arbitrary" grid axis over T
    # with online-softmax accumulators (running m / l / ctx) in VMEM scratch;
    # full-T residency per block is kept here since the module also returns the
    # full (B, T) attention_score.


def attention_forward(decoder_state, listener_feature,
                      w_phi, b_phi, w_psi, b_psi,
                      *, compute_dtype=jnp.float32, b_blk=None):
    """Forward pass of the LAS Attention module (mode='dot', MLP preprocess)."""
    B, _, D = decoder_state.shape
    T = listener_feature.shape[1]
    P = w_phi.shape[1]

    # Lane-dense 2-D decoder block: squeeze the size-1 "query" axis.
    dec2 = decoder_state[:, 0, :]                                   # (B, D)

    # Choose a batch block and pad B so the grid tiles it exactly.
    if b_blk is None:
        b_blk = B if B <= 128 else 128
    n_blocks = pl.cdiv(B, b_blk)
    B_pad = n_blocks * b_blk
    if B_pad != B:
        pad = B_pad - B
        dec2 = jnp.pad(dec2, ((0, pad), (0, 0)))
        listener_feature = jnp.pad(listener_feature, ((0, pad), (0, 0), (0, 0)))

    # Cast matmul operands once outside the kernel (halves DMA bytes when bf16);
    # biases / softmax stay f32 inside the kernel.
    dec_c = dec2.astype(compute_dtype)
    lis_c = listener_feature.astype(compute_dtype)
    wphi_c = w_phi.astype(compute_dtype)
    wpsi_c = w_psi.astype(compute_dtype)
    bphi = b_phi.reshape(1, P).astype(jnp.float32)
    bpsi = b_psi.reshape(1, P).astype(jnp.float32)

    score, ctx = pl.pallas_call(
        attention_kernel,
        out_shape=(
            jax.ShapeDtypeStruct((B_pad, T), jnp.float32),
            jax.ShapeDtypeStruct((B_pad, D), jnp.float32),
        ),
        grid=(n_blocks,),
        in_specs=[
            pl.BlockSpec((b_blk, D), lambda b: (b, 0)),       # decoder (B, D)
            pl.BlockSpec((b_blk, T, D), lambda b: (b, 0, 0)), # listener (B, T, D)
            # Weights/biases have a constant index_map (re-used every step).
            pl.BlockSpec((D, P), lambda b: (0, 0)),           # W_phi
            pl.BlockSpec((1, P), lambda b: (0, 0)),           # b_phi
            pl.BlockSpec((D, P), lambda b: (0, 0)),           # W_psi
            pl.BlockSpec((1, P), lambda b: (0, 0)),           # b_psi
        ],
        out_specs=(
            pl.BlockSpec((b_blk, T), lambda b: (b, 0)),       # attention_score
            pl.BlockSpec((b_blk, D), lambda b: (b, 0)),       # context
        ),
        compiler_params=pltpu.CompilerParams(
            dimension_semantics=("parallel",)),
    )(dec_c, lis_c, wphi_c, bphi, wpsi_c, bpsi)

    if B_pad != B:
        score = score[:B]
        ctx = ctx[:B]
    return score, ctx


def reference_forward(decoder_state, listener_feature, w_phi, b_phi, w_psi, b_psi):
    comp_dec = jax.nn.relu(decoder_state @ w_phi + b_phi)           # (B, 1, P)
    comp_lis = jax.nn.relu(listener_feature @ w_psi + b_psi)        # (B, T, P)
    energy = jnp.einsum('bup,btp->but', comp_dec, comp_lis)[:, 0]   # (B, T)
    attn = jax.nn.softmax(energy, axis=-1)
    ctx = jnp.sum(listener_feature * attn[:, :, None], axis=1)      # (B, D)
    return attn, ctx


if __name__ == "__main__":
    # batch, listener steps, input_feature_dim, preprocess_mlp_dim
    B, T, D, P = 2, 8, 32, 32

    key = jax.random.PRNGKey(0)
    k1, k2, k3, k4, k5, k6 = jax.random.split(key, 6)

    decoder_state = jax.random.normal(k1, (B, 1, D), dtype=jnp.float32)
    listener_feature = jax.random.normal(k2, (B, T, D), dtype=jnp.float32)

    # Deterministic parameter init (stored transposed: (in_dim D, out_dim P))
    w_phi = jax.random.normal(k3, (D, P), dtype=jnp.float32) * 0.1
    b_phi = jax.random.normal(k4, (1, P), dtype=jnp.float32) * 0.1
    w_psi = jax.random.normal(k5, (D, P), dtype=jnp.float32) * 0.1
    b_psi = jax.random.normal(k6, (1, P), dtype=jnp.float32) * 0.1

    attn_ref, ctx_ref = reference_forward(decoder_state, listener_feature,
                                          w_phi, b_phi, w_psi, b_psi)

    # f32 matmul operands (tight check; approx reciprocal in the softmax).
    attn, ctx = attention_forward(decoder_state, listener_feature,
                                  w_phi, b_phi, w_psi, b_psi,
                                  compute_dtype=jnp.float32)
    jax.block_until_ready((attn, ctx))
    assert attn.shape == (B, T) and ctx.shape == (B, D)
    assert jnp.allclose(attn, attn_ref, atol=2e-2, rtol=2e-2)
    assert jnp.allclose(ctx, ctx_ref, atol=2e-2, rtol=2e-2)

    # bf16 matmul operands, f32 accumulate / softmax (v6e/v7x fast path).
    attn_b, ctx_b = attention_forward(decoder_state, listener_feature,
                                      w_phi, b_phi, w_psi, b_psi,
                                      compute_dtype=jnp.bfloat16)
    jax.block_until_ready((attn_b, ctx_b))
    assert jnp.allclose(attn_b, attn_ref, atol=7e-2, rtol=7e-2)
    assert jnp.allclose(ctx_b, ctx_ref, atol=7e-2, rtol=7e-2)

    print("KERNEL_OK")
</pallas_src>

<mosaic_0001>
module attributes {stable_mosaic.version = 11 : i64} {
  func.func @attention_kernel(%arg0: i32, %arg1: memref<2x32xf32, #tpu.memory_space<vmem>>, %arg2: memref<2x8x32xf32, #tpu.memory_space<vmem>>, %arg3: memref<32x32xf32, #tpu.memory_space<vmem>>, %arg4: memref<1x32xf32, #tpu.memory_space<vmem>>, %arg5: memref<32x32xf32, #tpu.memory_space<vmem>>, %arg6: memref<1x32xf32, #tpu.memory_space<vmem>>, %arg7: memref<2x8xf32, #tpu.memory_space<vmem>>, %arg8: memref<2x32xf32, #tpu.memory_space<vmem>>) attributes {dimension_semantics = [#tpu.dimension_semantics<parallel>], iteration_bounds = array<i64: 1>, scalar_prefetch = 0 : i64, scratch_operands = 0 : i64, tpu.core_type = #tpu.core_type<tc>, window_params = [{transform_indices = @transform_0, window_bounds = array<i64: 2, 32>}, {transform_indices = @transform_1, window_bounds = array<i64: 2, 8, 32>}, {pipeline_mode = #tpu.pipeline_mode<synchronous>, transform_indices = @transform_2, window_bounds = array<i64: 32, 32>}, {pipeline_mode = #tpu.pipeline_mode<synchronous>, transform_indices = @transform_3, window_bounds = array<i64: 1, 32>}, {pipeline_mode = #tpu.pipeline_mode<synchronous>, transform_indices = @transform_4, window_bounds = array<i64: 32, 32>}, {pipeline_mode = #tpu.pipeline_mode<synchronous>, transform_indices = @transform_5, window_bounds = array<i64: 1, 32>}, {transform_indices = @transform_6, window_bounds = array<i64: 2, 8>}, {transform_indices = @transform_7, window_bounds = array<i64: 2, 32>}]} {
    %c0 = arith.constant 0 : index
    %c0_0 = arith.constant 0 : index
    %0 = vector.load %arg1[%c0, %c0_0] : memref<2x32xf32, #tpu.memory_space<vmem>>, vector<2x32xf32>
    %c0_1 = arith.constant 0 : index
    %c0_2 = arith.constant 0 : index
    %c0_3 = arith.constant 0 : index
    %1 = vector.load %arg2[%c0_1, %c0_2, %c0_3] : memref<2x8x32xf32, #tpu.memory_space<vmem>>, vector<2x8x32xf32>
    %c0_4 = arith.constant 0 : index
    %c0_5 = arith.constant 0 : index
    %2 = vector.load %arg3[%c0_4, %c0_5] : memref<32x32xf32, #tpu.memory_space<vmem>>, vector<32x32xf32>
    %cst = arith.constant dense<0.000000e+00> : vector<2x32xf32>
    %3 = tpu.matmul %0, %2, %cst {dimension_numbers = #tpu.dot_dimension_numbers<[1], [0], [0], [1], [0, 0, 1, 1], [], []>} : vector<2x32xf32>, vector<32x32xf32>, vector<2x32xf32> -> vector<2x32xf32>
    %c0_6 = arith.constant 0 : index
    %c0_7 = arith.constant 0 : index
    %4 = vector.load %arg4[%c0_6, %c0_7] : memref<1x32xf32, #tpu.memory_space<vmem>>, vector<1x32xf32>
    %5 = vector.broadcast %4 : vector<1x32xf32> to vector<2x32xf32>
    %6 = arith.addf %3, %5 : vector<2x32xf32>
    %cst_8 = arith.constant 0.000000e+00 : f32
    %7 = vector.broadcast %cst_8 : f32 to vector<2x32xf32>
    %8 = arith.maximumf %6, %7 : vector<2x32xf32>
    %9 = vector.shape_cast %1 : vector<2x8x32xf32> to vector<16x32xf32>
    %c0_9 = arith.constant 0 : index
    %c0_10 = arith.constant 0 : index
    %10 = vector.load %arg5[%c0_9, %c0_10] : memref<32x32xf32, #tpu.memory_space<vmem>>, vector<32x32xf32>
    %cst_11 = arith.constant dense<0.000000e+00> : vector<16x32xf32>
    %11 = tpu.matmul %9, %10, %cst_11 {dimension_numbers = #tpu.dot_dimension_numbers<[1], [0], [0], [1], [0, 0, 1, 1], [], []>} : vector<16x32xf32>, vector<32x32xf32>, vector<16x32xf32> -> vector<16x32xf32>
    %c0_12 = arith.constant 0 : index
    %c0_13 = arith.constant 0 : index
    %12 = vector.load %arg6[%c0_12, %c0_13] : memref<1x32xf32, #tpu.memory_space<vmem>>, vector<1x32xf32>
    %13 = vector.broadcast %12 : vector<1x32xf32> to vector<16x32xf32>
    %14 = arith.addf %11, %13 : vector<16x32xf32>
    %cst_14 = arith.constant 0.000000e+00 : f32
    %15 = vector.broadcast %cst_14 : f32 to vector<16x32xf32>
    %16 = arith.maximumf %14, %15 : vector<16x32xf32>
    %17 = vector.shape_cast %16 : vector<16x32xf32> to vector<2x8x32xf32>
    %18 = vector.shape_cast %8 : vector<2x32xf32> to vector<2x1x32xf32>
    %19 = vector.broadcast %18 : vector<2x1x32xf32> to vector<2x8x32xf32>
    %20 = arith.mulf %17, %19 : vector<2x8x32xf32>
    %cst_15 = arith.constant dense<0.000000e+00> : vector<2x8xf32>
    %21 = vector.multi_reduction <add>, %20, %cst_15 [2] : vector<2x8x32xf32> to vector<2x8xf32>
    %cst_16 = arith.constant dense<0xFF800000> : vector<2xf32>
    %22 = vector.multi_reduction <maximumf>, %21, %cst_16 [1] : vector<2x8xf32> to vector<2xf32>
    %23 = vector.shape_cast %22 : vector<2xf32> to vector<2x1xf32>
    %24 = vector.broadcast %23 : vector<2x1xf32> to vector<2x8xf32>
    %25 = arith.subf %21, %24 : vector<2x8xf32>
    %26 = math.exp %25 : vector<2x8xf32>
    %cst_17 = arith.constant dense<0.000000e+00> : vector<2xf32>
    %27 = vector.multi_reduction <add>, %26, %cst_17 [1] : vector<2x8xf32> to vector<2xf32>
    %28 = vector.shape_cast %27 : vector<2xf32> to vector<2x1xf32>
    %29 = tpu.reciprocal %28 {approx = true} : vector<2x1xf32> -> vector<2x1xf32>
    %30 = vector.broadcast %29 : vector<2x1xf32> to vector<2x8xf32>
    %31 = arith.mulf %26, %30 : vector<2x8xf32>
    %c0_18 = arith.constant 0 : index
    %c0_19 = arith.constant 0 : index
    %32 = vector.load %arg7[%c0_18, %c0_19] : memref<2x8xf32, #tpu.memory_space<vmem>>, vector<2x8xf32>
    tpu.vector_store %arg7[%c0_18, %c0_19], %31 {strides = array<i32>} : memref<2x8xf32, #tpu.memory_space<vmem>>, vector<2x8xf32>,
    %33 = vector.shape_cast %31 : vector<2x8xf32> to vector<2x8x1xf32>
    %34 = vector.broadcast %33 : vector<2x8x1xf32> to vector<2x8x32xf32>
    %35 = arith.mulf %1, %34 : vector<2x8x32xf32>
    %cst_20 = arith.constant dense<0.000000e+00> : vector<2x32xf32>
    %36 = vector.multi_reduction <add>, %35, %cst_20 [1] : vector<2x8x32xf32> to vector<2x32xf32>
    %c0_21 = arith.constant 0 : index
    %c0_22 = arith.constant 0 : index
    %37 = vector.load %arg8[%c0_21, %c0_22] : memref<2x32xf32, #tpu.memory_space<vmem>>, vector<2x32xf32>
    tpu.vector_store %arg8[%c0_21, %c0_22], %36 {strides = array<i32>} : memref<2x32xf32, #tpu.memory_space<vmem>>, vector<2x32xf32>,
    return
  }
  func.func @transform_0(%arg0: i32) -> (i32, i32) {
    %c0_i32 = arith.constant 0 : i32
    %c0_i32_0 = arith.constant 0 : i32
    return %arg0, %c0_i32 : i32, i32
  }
  func.func @transform_1(%arg0: i32) -> (i32, i32, i32) {
    %c0_i32 = arith.constant 0 : i32
    %c0_i32_0 = arith.constant 0 : i32
    %c0_i32_1 = arith.constant 0 : i32
    return %arg0, %c0_i32, %c0_i32_0 : i32, i32, i32
  }
  func.func @transform_2(%arg0: i32) -> (i32, i32) {
    %c0_i32 = arith.constant 0 : i32
    %c0_i32_0 = arith.constant 0 : i32
    %c0_i32_1 = arith.constant 0 : i32
    return %c0_i32, %c0_i32_0 : i32, i32
  }
  func.func @transform_3(%arg0: i32) -> (i32, i32) {
    %c0_i32 = arith.constant 0 : i32
    %c0_i32_0 = arith.constant 0 : i32
    %c0_i32_1 = arith.constant 0 : i32
    return %c0_i32, %c0_i32_0 : i32, i32
  }
  func.func @transform_4(%arg0: i32) -> (i32, i32) {
    %c0_i32 = arith.constant 0 : i32
    %c0_i32_0 = arith.constant 0 : i32
    %c0_i32_1 = arith.constant 0 : i32
    return %c0_i32, %c0_i32_0 : i32, i32
  }
  func.func @transform_5(%arg0: i32) -> (i32, i32) {
    %c0_i32 = arith.constant 0 : i32
    %c0_i32_0 = arith.constant 0 : i32
    %c0_i32_1 = arith.constant 0 : i32
    return %c0_i32, %c0_i32_0 : i32, i32
  }
  func.func @transform_6(%arg0: i32) -> (i32, i32) {
    %c0_i32 = arith.constant 0 : i32
    %c0_i32_0 = arith.constant 0 : i32
    return %arg0, %c0_i32 : i32, i32
  }
  func.func @transform_7(%arg0: i32) -> (i32, i32) {
    %c0_i32 = arith.constant 0 : i32
    %c0_i32_0 = arith.constant 0 : i32
    return %arg0, %c0_i32 : i32, i32
  }
}

</mosaic_0001>

<bundles_post_ra>
// kernel: tpu_custom_call.1
= control target key start
LH: loop header
LB: loop body
LE: loop exit
PB: predicated region body
PF: predicated region fallthrough
CT: control target
= control target key end

     0   :  { %13 = vsyncpa [#allocation3], 0  ;;  %s832_s0 = inlined_call_operand.hbm [shape: f32[2,32], index: 0, kind: input, shape index: {}]   ;;  %s833_s1 = inlined_call_operand.hbm [shape: f32[2,8,32], index: 1, kind: input, shape index: {}]   ;;  %s834_s2 = inlined_call_operand.hbm [shape: f32[32,32], index: 2, kind: input, shape index: {}]   ;;  %s835_s3 = inlined_call_operand.vmem [shape: f32[1,32], index: 3, kind: input, shape index: {}]   ;;  %s836_s4 = inlined_call_operand.hbm [shape: f32[32,32], index: 4, kind: input, shape index: {}]   ;;  %s837_s5 = inlined_call_operand.vmem [shape: f32[1,32], index: 5, kind: input, shape index: {}]   ;;  %s838_s6 = inlined_call_operand.hbm [shape: f32[2,8], index: 6, kind: output, shape index: {0}]   ;;  %s839_s7 = inlined_call_operand.hbm [shape: f32[2,32], index: 7, kind: output, shape index: {1}]  }
   0x1   :  { %14 = vsyncpa [#allocation6], 0 }
   0x2   :  { %15 = vsyncpa [#allocation9], 0 }
   0x3   :  { %16 = vsyncpa [#allocation4], 0 }
   0x4   :  { %17 = vsyncpa [#allocation12], 0  ;;  %s664_s24 = smov [#allocation5]   ;;  %s522_s28 = scalar_lea.hbm %s833_s1, 256 }
   0x5   :  { %s33_s25 = sshll.u32 %s664_s24, 4  ;;  %p523_p0 = scmp.ne.s32.totalorder %s833_s1, %s522_s28  ;;  %s34_s25 = int_to_ptr.vmem [resolvable:$true] %s33_s25 }
   0x6   :  { %p526_p1 = scmp.lt.u32.totalorder %s522_s28, %s833_s1 }
   0x8   :  { %p528_p2 = pnand %p526_p1, %p523_p0 }
   0xa   :  { %531 = shalt.err (!%p528_p2)
}
   0xb   :  { %s532_s10 = scalar_lea.vmem %s34_s25, 256  ;;  %p537_p4 = scmp.lt.s32.totalorder %s34_s25, %s34_s25 }
   0xc   :  { %p533_p3 = scmp.ne.s32.totalorder %s34_s25, %s532_s10  ;;  %p538_p5 = scmp.lt.s32.totalorder %s532_s10, %s532_s10 }
   0xe   :  { %p539_p6 = por %p538_p5, %p537_p4 }
  0x10   :  { %p540_p7 = pnand %p539_p6, %p533_p3 }
  0x12   :  { %543 = shalt.err (!%p540_p7)
}
  0x13   :  { %s665_s11 = smov 128   ;;  %s666_s12 = smov 8  }
  0x14   :  { %39 = dma.hbm_to_vmem [thread:$0]  %s833_s1, 256, %s34_s25, [#allocation6], %s665_s11, %s665_s11, %s666_s12  }
  0x15   :  { %s667_s15 = smov [#allocation2]   ;;  %s668_s17 = smov [#allocation7]  }
  0x16   :  { %s24_s16 = sshll.u32 %s667_s15, 4  ;;  %s45_s18 = sshll.u32 %s668_s17, 4  ;;  %s25_s16 = int_to_ptr.vmem [resolvable:$true] %s24_s16  ;;  %s46_s18 = int_to_ptr.vmem [resolvable:$true] %s45_s18 }
  0x17   :  { %s544_s21 = scalar_lea.hbm %s832_s0, 32 }
  0x18   :  { %p545_p8 = scmp.ne.s32.totalorder %s832_s0, %s544_s21  ;;  %p548_p9 = scmp.lt.u32.totalorder %s544_s21, %s832_s0 }
  0x1a   :  { %p550_p10 = pnand %p548_p9, %p545_p8 }
  0x1c   :  { %553 = shalt.err (!%p550_p10)
}
  0x1d   :  { %s554_s1 = scalar_lea.vmem %s25_s16, 32  ;;  %p559_p12 = scmp.lt.s32.totalorder %s25_s16, %s25_s16 }
  0x1e   :  { %p555_p11 = scmp.ne.s32.totalorder %s25_s16, %s554_s1  ;;  %p560_p13 = scmp.lt.s32.totalorder %s554_s1, %s554_s1 }
  0x20   :  { %p561_p0 = por %p560_p13, %p559_p12 }
  0x22   :  { %p562_p1 = pnand %p561_p0, %p555_p11 }
  0x24   :  { %565 = shalt.err (!%p562_p1)
}
  0x25   :  { %27 = dma.hbm_to_vmem [thread:$0]  %s832_s0, 32, %s25_s16, [#allocation3]  }
  0x26   :  { %s566_s30 = scalar_lea.hbm %s834_s2, 512 }
  0x27   :  { %p567_p2 = scmp.ne.s32.totalorder %s834_s2, %s566_s30  ;;  %p570_p3 = scmp.lt.u32.totalorder %s566_s30, %s834_s2 }
  0x29   :  { %p572_p4 = pnand %p570_p3, %p567_p2 }
  0x2b   :  { %575 = shalt.err (!%p572_p4)
}
  0x2c   :  { %s576_s14 = scalar_lea.vmem %s46_s18, 512  ;;  %p581_p6 = scmp.lt.s32.totalorder %s46_s18, %s46_s18 }
  0x2d   :  { %p577_p5 = scmp.ne.s32.totalorder %s46_s18, %s576_s14  ;;  %p582_p7 = scmp.lt.s32.totalorder %s576_s14, %s576_s14 }
  0x2f   :  { %p583_p8 = por %p582_p7, %p581_p6 }
  0x31   :  { %p584_p9 = pnand %p583_p8, %p577_p5 }
  0x33   :  { %587 = shalt.err (!%p584_p9)
}
  0x34   :  { %51 = dma.hbm_to_vmem [thread:$0]  %s834_s2, 512, %s46_s18, [#allocation6], %s665_s11, %s665_s11, %s666_s12  }
  0x35   :  { %s669_s16 = smov [#allocation8]   ;;  %s588_s21 = scalar_lea.hbm %s836_s4, 512 }
  0x36   :  { %s59_s17 = sshll.u32 %s669_s16, 4  ;;  %p589_p10 = scmp.ne.s32.totalorder %s836_s4, %s588_s21  ;;  %s60_s17 = int_to_ptr.vmem [resolvable:$true] %s59_s17 }
  0x37   :  { %p592_p11 = scmp.lt.u32.totalorder %s588_s21, %s836_s4 }
  0x39   :  { %p594_p12 = pnand %p592_p11, %p589_p10 }
  0x3b   :  { %597 = shalt.err (!%p594_p12)
}
  0x3c   :  { %s598_s1 = scalar_lea.vmem %s60_s17, 512  ;;  %p603_p0 = scmp.lt.s32.totalorder %s60_s17, %s60_s17 }
  0x3d   :  { %p599_p13 = scmp.ne.s32.totalorder %s60_s17, %s598_s1  ;;  %p604_p1 = scmp.lt.s32.totalorder %s598_s1, %s598_s1 }
  0x3f   :  { %p605_p2 = por %p604_p1, %p603_p0 }
  0x41   :  { %p606_p3 = pnand %p605_p2, %p599_p13 }
  0x43   :  { %609 = shalt.err (!%p606_p3)
}
  0x44   :  { %65 = dma.hbm_to_vmem [thread:$0]  %s836_s4, 512, %s60_s17, [#allocation9], %s665_s11, %s665_s11, %s666_s12  }
  0x45   :  { %654 = dma.done.wait [#allocation3], 32  }
  0x46   :  { %655 = vsyncadd [#allocation3], 4294967264 }
  0x47   :  { %656 = dma.done.wait [#allocation6], 768  }
  0x48   :  { %657 = vsyncadd [#allocation6], 4294966528 }
  0x49   :  { %658 = dma.done.wait [#allocation9], 512  }
  0x4a   :  { %659 = vsyncadd [#allocation9], 4294966784  ;;  %v670_v0 = vmov 0.0|0.0   ;;  %vm671_vm0 = vmmov 0   ;;  %v672_v1 = vmov 0.0   ;;  %v83_v2 = vld [vmem:[#allocation7] sm:$0xff]  ;;  %v267_v19 = vlaneseq }
  0x4b   :  { %487 = vmatprep.subr.bf16.mxu0 %v670_v0  ;;  %473 = vmatprep.mubr.msk.f32.mxu0 %vm671_vm0, %v672_v1  ;;  %v84_v3 = vld [vmem:[#allocation7 + $0x8] sm:$0xff]  ;;  %v169_v4 = vld [vmem:[#allocation8] sm:$0xff]  ;;  %v85_v7 = vld [vmem:[#allocation7 + $0x10] sm:$0xff]  ;;  %vm94_vm1 = vcmask 261120   ;;  %v673_v17 = vmov 1966171168  }
  0x4c   :  { %v488_v5 = vpack.c.bf16 %v84_v3, %v83_v2  ;;  %v170_v6 = vld [vmem:[#allocation8 + $0x8] sm:$0xff]  ;;  %v86_v8 = vld [vmem:[#allocation7 + $0x18] sm:$0xff]  ;;  %v171_v10 = vld [vmem:[#allocation8 + $0x10] sm:$0xff]  ;;  %v265_v18 = vunpack.c.l.s4 %v673_v17  ;;  %v783_v21 = vshrl.u32 %v267_v19, 7  ;;  %v307_v46 = vand.u32 127, %v267_v19 }
  0x4d   :  { %v493_v9 = vpack.c.bf16 %v170_v6, %v169_v4  ;;  %v172_v11 = vld [vmem:[#allocation8 + $0x18] sm:$0xff]  ;;  %v491_v12 = vpack.c.bf16 %v86_v8, %v85_v7  ;;  %v774_v14 = vld [vmem:[#allocation5] sm:$0xff]  ;;  %v80_v15 = vld [vmem:[#allocation2] sm:$0x3]  ;;  %vm316_vm2 = vcmask 1041409   ;;  %vm319_vm3 = vcmask 58368  }
  0x4e   :  { %489 = vmatpush3.bf16.msra.mxu0 %v488_v5  ;;  %v497_v13 = vpack.c.bf16 %v172_v11, %v171_v10  ;;  %484 = vmatprep.mubr.msk.f32.mxu1 %vm94_vm1, %v774_v14  ;;  %v778_v16 = vld [vmem:[#allocation5 + $0x8] sm:$0xff]  ;;  %v266_v20 = vunpack.c.0.s8 %v265_v18  ;;  %v449_v22 = vld [vmem:[%s835_s3] ss:$0 sm:$0xff]  ;;  %v288_v33 = vsub.s32 0, %v783_v21  ;;  %v310_v48 = vsub.s32 %v307_v46, %v783_v21  ;;  %s675_s3 = smov [#allocation10]  }
  0x4f   :  { %490 = vmatprep.subr.bf16.mxu0 %v670_v0  ;;  %494 = vmatprep.subr.bf16.mxu1 %v493_v9  ;;  %v451_v27 = vld [vmem:[%s837_s5] ss:$0 sm:$0xff]  ;;  %v674_v54 = vmov 0   ;;  %v330_v55 = vsub.s32 1, %v783_v21  ;;  %s424_s5 = sshll.u32 %s675_s3, 4  ;;  %s425_s5 = int_to_ptr.vmem [resolvable:$true] %s424_s5 }
  0x50   :  { %496 = vmatpush3.bf16.msra.mxu1 %v493_v9  ;;  %v269_v25 = vsub.s32 %v266_v20, %v783_v21  ;;  %515 = vset.pattern.permute.xlu0 %v674_v54  ;;  %s610_s27 = scalar_lea.vmem %s425_s5, 32  ;;  %p615_p5 = scmp.lt.s32.totalorder %s425_s5, %s425_s5 }
  0x51   :  { %498 = vmatprep.subr.bf16.mxu1 %v497_v13  ;;  %514 = vset.pattern.permute.xlu1 %v674_v54  ;;  %p611_p4 = scmp.ne.s32.totalorder %s425_s5, %s610_s27  ;;  %p616_p6 = scmp.lt.s32.totalorder %s610_s27, %s610_s27 }
  0x52   :  { %492 = vmatpush3.bf16.msra.mxu0 %v491_v12 }
  0x53   :  { %p617_p7 = por %p616_p6, %p615_p5 }
  0x54   :  { %500 = vmatpush3.bf16.msra.mxu1 %v497_v13 }
  0x55   :  { %474 = vmatmul.mubr.msk.f32.vlgmr.msra.gmra.mrb[0].mxu0 %vm94_vm1, %v80_v15  ;;  %p618_p8 = pnand %p617_p7, %p611_p4 }
  0x57   :  { %485 = vmatmul.mubr.msk.f32.vlgmr.msra.gmra.mrb[0].mxu1 %vm94_vm1, %v778_v16 }
 0x128   :  { %v164_v23 = vpop.f32.mrb[0].mxu0 }
 0x129   :  { %v165_v24 = vadd.f32 %v449_v22, %v164_v23  ;;  %v475_v26 = vpop.f32.mrb[1].mxu0 }
 0x12a   :  { %v486_v28 = vpop.f32.mrb[0].mxu1 }
 0x12b   :  { %v168_v29 = vmax.f32 %v165_v24, 0.0  ;;  %v252_v30 = vpop.f32.mrb[1].mxu1  ;;  %v258_v36 = vadd.f32 %v486_v28, %v451_v27 }
 0x12c   :  { %v253_v31 = vadd.f32 %v451_v27, %v252_v30 }
 0x12d   :  { %v270_v32 = vrot.slane %v168_v29, %v269_v25  ;;  %v262_v40 = vmax.f32 %v258_v36, 0.0 }
 0x12e   :  { %v261_v37 = vmax.f32 %v253_v31, 0.0 }
 0x12f   :  { %v271_v34 = vcombine.high %v270_v32, %v270_v32  ;;  %v278_v35 = vrot.slane %v270_v32, %v269_v25 }
 0x131   :  { %v289_v38 = vrot.slane %v278_v35, %v288_v33  ;;  %v285_v39 = vrot.slane %v271_v34, %v269_v25 }
 0x133   :  { %v296_v41 = vmul.f32 %v289_v38, %v261_v37  ;;  %v293_v42 = vrot.slane %v285_v39, %v288_v33 }
 0x135   :  { %v298_v43 = vsel %vm94_vm1, %v296_v41, 0.0  ;;  %v297_v44 = vmul.f32 %v293_v42, %v262_v40 }
 0x136   :  { %299 = vadd.xlane.f32.xlu0 %v298_v43 }
 0x137   :  { %v301_v45 = vsel %vm94_vm1, %v297_v44, 0.0 }
 0x13a   :  { %302 = vadd.xlane.f32.xlu0 %v301_v45 }
 0x1c3   :  { %v300_v47 = vpop.xlane.xlu0 %299 }
 0x1c4   :  { %v311_v50 = vrot.slane %v300_v47, %v310_v48 }
 0x1c7   :  { %v303_v49 = vpop.xlane.xlu0 %302 }
 0x1c8   :  { %v315_v51 = vrot.slane %v303_v49, %v310_v48 }
 0x1ca   :  { %v317_v52 = vsel %vm316_vm2, %v315_v51, %v311_v50 }
 0x1cb   :  { %v320_v53 = vsel %vm319_vm3, %v317_v52, -inf }
 0x1cc   :  { %321 = vmax.xlane.f32.xlu1 %v320_v53 }
 0x259   :  { %v322_v56 = vpop.xlane.xlu1 %321 }
 0x25a   :  { %v327_v57 = vrot.slane %v322_v56, %v288_v33  ;;  %v331_v58 = vrot.slane %v322_v56, %v330_v55 }
 0x25c   :  { %v334_v59 = vsub.f32 %v300_v47, %v327_v57  ;;  %v335_v60 = vsub.f32 %v303_v49, %v331_v58 }
 0x25e   :  { %v336_v61 = vmul.f32 1.442695, %v334_v59  ;;  %v338_v62 = vmul.f32 1.442695, %v335_v60 }
 0x260   :  { %516 = vpow2.f32 %v336_v61 }
 0x261   :  { %518 = vpow2.f32 %v338_v62 }
 0x26a   :  { %v517_v63 = vpop.eup %516 }
 0x26b   :  { %v519_v0 = vpop.eup %518  ;;  %343 = vperm.xlu1 %514, %v517_v63  }
 0x26c   :  { %346 = vperm.xlu0 %515, %v519_v0  }
 0x2ea   :  { %v344_v1 = vpop.permute.xlu1 %343 }
 0x2eb   :  { %v347_v2 = vpop.permute.xlu0 %346  ;;  %v351_v3 = vrot.slane %v344_v1, %v310_v48 }
 0x2ec   :  { %v355_v4 = vrot.slane %v347_v2, %v310_v48 }
 0x2ee   :  { %v356_v5 = vsel %vm316_vm2, %v355_v4, %v351_v3 }
 0x2ef   :  { %v358_v6 = vsel %vm319_vm3, %v356_v5, 0.0 }
 0x2f0   :  { %359 = vadd.xlane.f32.xlu1 %v358_v6 }
 0x37d   :  { %v360_v7 = vpop.xlane.xlu1 %359 }
 0x37e   :  { %520 = vrcp.f32 %v360_v7 }
 0x388   :  { %v521_v8 = vpop.eup %520 }
 0x389   :  { %v366_v9 = vrot.slane %v521_v8, %v288_v33  ;;  %v370_v11 = vrot.slane %v521_v8, %v330_v55 }
 0x38b   :  { %v373_v10 = vmul.f32 %v517_v63, %v366_v9  ;;  %v374_v12 = vmul.f32 %v519_v0, %v370_v11 }
 0x38d   :  { %378 = vperm.xlu0 %515, %v373_v10  }
 0x391   :  { %381 = vperm.xlu0 %515, %v374_v12  }
 0x40c   :  { %v379_v13 = vpop.permute.xlu0 %378 }
 0x40d   :  { %v396_v15 = vmul.f32 %v379_v13, %v774_v14  ;;  %v386_v20 = vrot.slane %v379_v13, %v310_v48 }
 0x40f   :  { %v398_v17 = vsel %vm94_vm1, %v396_v15, 0.0 }
 0x410   :  { %v399_v18 = vrot.slane %v398_v17, 4  ;;  %v382_v19 = vpop.permute.xlu0 %381 }
 0x411   :  { %v390_v21 = vrot.slane %v382_v19, %v310_v48  ;;  %v397_v22 = vmul.f32 %v382_v19, %v778_v16 }
 0x412   :  { %v400_v23 = vadd.f32 %v399_v18, %v398_v17 }
 0x413   :  { %v405_v24 = vsel %vm94_vm1, %v397_v22, 0.0  ;;  %v391_v25 = vsel %vm316_vm2, %v390_v21, %v386_v20 }
 0x414   :  { %v401_v26 = vrot.slane %v400_v23, 2  ;;  %v406_v27 = vrot.slane %v405_v24, 4  ;;  %393 = vst.msk [vmem:[#allocation10] sm:$0x3] %vm319_vm3, %v391_v25 }
 0x415   :  { %621 = shalt.err (!%p618_p8)
}
 0x416   :  { %s622_s30 = scalar_lea.hbm %s838_s6, 32 }
 0x417   :  { %p623_p9 = scmp.ne.s32.totalorder %s838_s6, %s622_s30  ;;  %p626_p10 = scmp.lt.u32.totalorder %s622_s30, %s838_s6 }
 0x419   :  { %p628_p11 = pnand %p626_p10, %p623_p9 }
 0x41b   :  { %631 = shalt.err (!%p628_p11)
}
 0x41c   :  { %427 = dma.vmem_to_hbm [thread:$0]  %s425_s5, 32, %s838_s6, [#allocation4]   ;;  %v402_v14 = vadd.f32 %v401_v26, %v400_v23  ;;  %v407_v16 = vadd.f32 %v406_v27, %v405_v24  ;;  %vm416_vm4 = vcmask 254976  }
 0x41d   :  { %s676_s15 = smov [#allocation11]  }
 0x41e   :  { %v408_v28 = vrot.slane %v407_v16, 2  ;;  %v403_v29 = vrot.slane %v402_v14, 1  ;;  %s434_s16 = sshll.u32 %s676_s15, 4  ;;  %s435_s16 = int_to_ptr.vmem [resolvable:$true] %s434_s16 }
 0x41f   :  { %s632_s17 = scalar_lea.vmem %s435_s16, 32  ;;  %p637_p13 = scmp.lt.s32.totalorder %s435_s16, %s435_s16 }
 0x420   :  { %v409_v30 = vadd.f32 %v408_v28, %v407_v16  ;;  %v404_v33 = vadd.f32 %v403_v29, %v402_v14  ;;  %p633_p12 = scmp.ne.s32.totalorder %s435_s16, %s632_s17  ;;  %p638_p0 = scmp.lt.s32.totalorder %s632_s17, %s632_s17 }
 0x422   :  { %v410_v31 = vrot.slane %v409_v30, 1  ;;  %p639_p1 = por %p638_p0, %p637_p13 }
 0x424   :  { %v411_v32 = vadd.f32 %v410_v31, %v409_v30  ;;  %p640_p2 = pnand %p639_p1, %p633_p12 }
 0x426   :  { %v414_v34 = vsel %vm316_vm2, %v411_v32, %v404_v33 }
 0x427   :  { %417 = vst.msk [vmem:[#allocation11] sm:$0x3] %vm416_vm4, %v414_v34 }
 0x428   :  { %643 = shalt.err (!%p640_p2)
}
 0x429   :  { %s644_s20 = scalar_lea.hbm %s839_s7, 32 }
 0x42a   :  { %p645_p3 = scmp.ne.s32.totalorder %s839_s7, %s644_s20  ;;  %p648_p4 = scmp.lt.u32.totalorder %s644_s20, %s839_s7 }
 0x42c   :  { %p650_p5 = pnand %p648_p4, %p645_p3 }
 0x42e   :  { %653 = shalt.err (!%p650_p5)
}
 0x42f   :  { %437 = dma.vmem_to_hbm [thread:$0]  %s435_s16, 32, %s839_s7, [#allocation12]  }
 0x430   :  { %660 = dma.done.wait [#allocation4], 32  }
 0x431   :  { %661 = vsyncadd [#allocation4], 4294967264 }
 0x432   :  { %662 = dma.done.wait [#allocation12], 32  }
 0x433   :  { %663 = vsyncadd [#allocation12], 4294967264 }
 0x434   :  { %444 = vsyncpa [#allocation3], 1 }
 0x435   :  { %445 = vsyncpa [#allocation6], 1 }
 0x436   :  { %446 = vsyncpa [#allocation9], 1 }
 0x437   :  { %447 = vsyncpa [#allocation4], 1 }
 0x438   :  { %448 = vsyncpa [#allocation12], 1 }

</bundles_post_ra>
